<compile_context>
chip_gen: v6e
topology: v6e:2x2x1
jax: 0.10.0
libtpu: 0.0.40
codegen_flags: <defaults>
</compile_context>

<pallas_src>
import jax
import jax.numpy as jnp
from jax.experimental import pallas as pl
from jax.experimental.pallas import tpu as pltpu

D_IN, D_H1, D_H2, D_OUT = 128, 256, 64, 1


def _round_up(n, m):
    return ((n + m - 1) // m) * m


def mlp_kernel(x_ref, w1_ref, b1_ref, w23_ref, b23_ref, o_ref):
    # Layer 1: cast x to bf16 in-kernel (VPU, hidden under the x DMA), MXU
    # matmul with f32 accumulation, f32 bias add.
    x_bf = x_ref[...].astype(jnp.bfloat16)
    h1 = jnp.dot(x_bf, w1_ref[...], preferred_element_type=jnp.float32)
    h1 = h1 + b1_ref[...]
    # Layers 2+3 folded into a single 256-wide row (exact, no nonlinearity):
    # VPU multiply + XLU lane-reduce instead of a quarter-utilized MXU pass.
    y = jnp.sum(h1 * w23_ref[...], axis=-1, keepdims=True) + b23_ref[...]
    o_ref[...] = y.astype(o_ref.dtype)


def prepare_params(w1, b1, w2, b2, w3, b3):
    """One-time weight prep: bf16 cast for the MXU + exact fold of layers 2+3."""
    w1_bf = w1.astype(jnp.bfloat16)                            # (128, 256)
    b1_f = b1.reshape(1, D_H1).astype(jnp.float32)             # (1, 256)
    w3_f = w3.reshape(D_H2, D_OUT).astype(jnp.float32)         # (64, 1)
    w23 = (w2.astype(jnp.float32) @ w3_f).reshape(1, D_H1)     # (1, 256) row
    b23 = (b2.reshape(1, D_H2).astype(jnp.float32) @ w3_f
           + b3.reshape(1, D_OUT).astype(jnp.float32))         # (1, 1)
    return w1_bf, b1_f, w23, b23


def _pick_tile(B, tile_b):
    if B < 8:
        return B  # block equal to the full (tiny) batch dim is allowed
    # Aim for >= ~4 grid steps (v7x megacore sharding + full DMA pipeline);
    # tile is a multiple of 8, capped at tile_b.
    return min(tile_b, max(8, _round_up(pl.cdiv(B, 4), 8)))


def toy_model_forward(x, params, *, tile_b=2048):
    """Fused ToyModel forward. x: (B, 128) float32 -> (B, 1) float32."""
    w1_bf, b1_f, w23, b23 = params
    B = x.shape[0]
    tile = _pick_tile(B, tile_b)
    grid = (pl.cdiv(B, tile),)

    # Whole-array weight blocks with invariant index maps: DMA'd once, resident
    # in VMEM across all grid steps.
    full = lambda shape: pl.BlockSpec(shape, lambda i: (0,) * len(shape))

    return pl.pallas_call(
        mlp_kernel,
        out_shape=jax.ShapeDtypeStruct((B, D_OUT), jnp.float32),
        grid=grid,
        in_specs=[
            pl.BlockSpec((tile, D_IN), lambda i: (i, 0)),  # x tile (f32)
            full((D_IN, D_H1)),                            # W1 (bf16)
            full((1, D_H1)),                               # b1 (f32)
            full((1, D_H1)),                               # w23 = W2 @ w3 (f32)
            full((1, D_OUT)),                              # b23 (f32)
        ],
        out_specs=pl.BlockSpec((tile, D_OUT), lambda i: (i, 0)),
        compiler_params=pltpu.CompilerParams(
            dimension_semantics=("parallel",),  # batch tiles shard across TCs
        ),
    )(x, w1_bf, b1_f, w23, b23)


def init_params(key):
    # Deterministic synthetic init (PyTorch-style uniform bounds, not a checkpoint).
    ks = jax.random.split(key, 6)

    def linear(kw, kb, d_in, d_out):
        bound = 1.0 / jnp.sqrt(d_in)
        w = jax.random.uniform(kw, (d_in, d_out), jnp.float32, -bound, bound)
        b = jax.random.uniform(kb, (1, d_out), jnp.float32, -bound, bound)
        return w, b

    w1, b1 = linear(ks[0], ks[1], D_IN, D_H1)
    w2, b2 = linear(ks[2], ks[3], D_H1, D_H2)
    w3, b3 = linear(ks[4], ks[5], D_H2, D_OUT)
    return w1, b1, w2, b2, w3, b3


if __name__ == "__main__":
    key = jax.random.PRNGKey(0)
    k_x, k_p = jax.random.split(key)

    B = 16  # small batch for the self-test; tile logic still gives a 2-step grid
    x = jax.random.normal(k_x, (B, D_IN), jnp.float32)
    w1, b1, w2, b2, w3, b3 = init_params(k_p)
    params = prepare_params(w1, b1, w2, b2, w3, b3)

    out = toy_model_forward(x, params)
    out = jax.block_until_ready(out)

    # Pure-JAX f32 reference of the original 3-layer forward. bf16 MXU operands
    # for x/W1 (with f32 accumulation) need a loosened tolerance vs. full f32.
    ref = ((x @ w1 + b1) @ w2 + b2) @ w3 + b3
    assert out.shape == (B, D_OUT)
    assert jnp.allclose(out, ref, atol=2e-2, rtol=2e-2), (
        float(jnp.max(jnp.abs(out - ref))))

    print("KERNEL_OK")
</pallas_src>

<mosaic_0001>
module attributes {stable_mosaic.version = 11 : i64} {
  func.func @mlp_kernel(%arg0: i32, %arg1: memref<8x128xf32, #tpu.memory_space<vmem>>, %arg2: memref<128x256xbf16, #tpu.memory_space<vmem>>, %arg3: memref<1x256xf32, #tpu.memory_space<vmem>>, %arg4: memref<1x256xf32, #tpu.memory_space<vmem>>, %arg5: memref<1x1xf32, #tpu.memory_space<vmem>>, %arg6: memref<8x1xf32, #tpu.memory_space<vmem>>) attributes {dimension_semantics = [#tpu.dimension_semantics<parallel>], iteration_bounds = array<i64: 2>, scalar_prefetch = 0 : i64, scratch_operands = 0 : i64, tpu.core_type = #tpu.core_type<tc>, window_params = [{transform_indices = @transform_0, window_bounds = array<i64: 8, 128>}, {pipeline_mode = #tpu.pipeline_mode<synchronous>, transform_indices = @transform_1, window_bounds = array<i64: 128, 256>}, {pipeline_mode = #tpu.pipeline_mode<synchronous>, transform_indices = @transform_2, window_bounds = array<i64: 1, 256>}, {pipeline_mode = #tpu.pipeline_mode<synchronous>, transform_indices = @transform_3, window_bounds = array<i64: 1, 256>}, {pipeline_mode = #tpu.pipeline_mode<synchronous>, transform_indices = @transform_4, window_bounds = array<i64: 1, 1>}, {transform_indices = @transform_5, window_bounds = array<i64: 8, 1>}]} {
    %c0 = arith.constant 0 : index
    %c0_0 = arith.constant 0 : index
    %0 = vector.load %arg1[%c0, %c0_0] : memref<8x128xf32, #tpu.memory_space<vmem>>, vector<8x128xf32>
    %1 = arith.truncf %0 : vector<8x128xf32> to vector<8x128xbf16>
    %c0_1 = arith.constant 0 : index
    %c0_2 = arith.constant 0 : index
    %2 = vector.load %arg2[%c0_1, %c0_2] : memref<128x256xbf16, #tpu.memory_space<vmem>>, vector<128x256xbf16>
    %cst = arith.constant dense<0.000000e+00> : vector<8x256xf32>
    %3 = tpu.matmul %1, %2, %cst {dimension_numbers = #tpu.dot_dimension_numbers<[1], [0], [0], [1], [0, 0, 1, 1], [], []>} : vector<8x128xbf16>, vector<128x256xbf16>, vector<8x256xf32> -> vector<8x256xf32>
    %c0_3 = arith.constant 0 : index
    %c0_4 = arith.constant 0 : index
    %4 = vector.load %arg3[%c0_3, %c0_4] : memref<1x256xf32, #tpu.memory_space<vmem>>, vector<1x256xf32>
    %5 = vector.broadcast %4 : vector<1x256xf32> to vector<8x256xf32>
    %6 = arith.addf %3, %5 : vector<8x256xf32>
    %c0_5 = arith.constant 0 : index
    %c0_6 = arith.constant 0 : index
    %7 = vector.load %arg4[%c0_5, %c0_6] : memref<1x256xf32, #tpu.memory_space<vmem>>, vector<1x256xf32>
    %8 = vector.broadcast %7 : vector<1x256xf32> to vector<8x256xf32>
    %9 = arith.mulf %6, %8 : vector<8x256xf32>
    %cst_7 = arith.constant dense<0.000000e+00> : vector<8xf32>
    %10 = vector.multi_reduction <add>, %9, %cst_7 [1] : vector<8x256xf32> to vector<8xf32>
    %11 = vector.shape_cast %10 : vector<8xf32> to vector<8x1xf32>
    %c0_8 = arith.constant 0 : index
    %c0_9 = arith.constant 0 : index
    %12 = vector.load %arg5[%c0_8, %c0_9] : memref<1x1xf32, #tpu.memory_space<vmem>>, vector<1x1xf32>
    %13 = vector.broadcast %12 : vector<1x1xf32> to vector<8x1xf32>
    %14 = arith.addf %11, %13 : vector<8x1xf32>
    %c0_10 = arith.constant 0 : index
    %c0_11 = arith.constant 0 : index
    %15 = vector.load %arg6[%c0_10, %c0_11] : memref<8x1xf32, #tpu.memory_space<vmem>>, vector<8x1xf32>
    tpu.vector_store %arg6[%c0_10, %c0_11], %14 {strides = array<i32>} : memref<8x1xf32, #tpu.memory_space<vmem>>, vector<8x1xf32>,
    return
  }
  func.func @transform_0(%arg0: i32) -> (i32, i32) {
    %c0_i32 = arith.constant 0 : i32
    %c0_i32_0 = arith.constant 0 : i32
    return %arg0, %c0_i32 : i32, i32
  }
  func.func @transform_1(%arg0: i32) -> (i32, i32) {
    %c0_i32 = arith.constant 0 : i32
    %c0_i32_0 = arith.constant 0 : i32
    %c0_i32_1 = arith.constant 0 : i32
    return %c0_i32, %c0_i32_0 : i32, i32
  }
  func.func @transform_2(%arg0: i32) -> (i32, i32) {
    %c0_i32 = arith.constant 0 : i32
    %c0_i32_0 = arith.constant 0 : i32
    %c0_i32_1 = arith.constant 0 : i32
    return %c0_i32, %c0_i32_0 : i32, i32
  }
  func.func @transform_3(%arg0: i32) -> (i32, i32) {
    %c0_i32 = arith.constant 0 : i32
    %c0_i32_0 = arith.constant 0 : i32
    %c0_i32_1 = arith.constant 0 : i32
    return %c0_i32, %c0_i32_0 : i32, i32
  }
  func.func @transform_4(%arg0: i32) -> (i32, i32) {
    %c0_i32 = arith.constant 0 : i32
    %c0_i32_0 = arith.constant 0 : i32
    %c0_i32_1 = arith.constant 0 : i32
    return %c0_i32, %c0_i32_0 : i32, i32
  }
  func.func @transform_5(%arg0: i32) -> (i32, i32) {
    %c0_i32 = arith.constant 0 : i32
    %c0_i32_0 = arith.constant 0 : i32
    return %arg0, %c0_i32 : i32, i32
  }
}

</mosaic_0001>

<bundles_post_ra>
// kernel: tpu_custom_call.1
= control target key start
LH: loop header
LB: loop body
LE: loop exit
PB: predicated region body
PF: predicated region fallthrough
CT: control target
= control target key end

     0   :  { %s877_s0 = inlined_call_operand.hbm [shape: f32[16,128], index: 0, kind: input, shape index: {}]   ;;  %s878_s1 = inlined_call_operand.hbm [shape: bf16[128,256], index: 1, kind: input, shape index: {}]   ;;  %s879_s2 = inlined_call_operand.vmem [shape: f32[1,256], index: 2, kind: input, shape index: {}]   ;;  %s880_s3 = inlined_call_operand.vmem [shape: f32[1,256], index: 3, kind: input, shape index: {}]   ;;  %s881_s4 = inlined_call_operand.<no memory space> [shape: f32[1,1], index: 4, kind: input, shape index: {}]   ;;  %s882_s5 = inlined_call_operand.vmem [shape: f32[16,1], index: 5, kind: output, shape index: {}]  }
   0x1   :  { %v10_v0 = vstv %s881_s4 }
   0x2   :  { %11 = vst [vmem:[#allocation2] sm:$0x1] %v10_v0 }
   0x3   :  { %12 = vsyncpa [#allocation4], 0 }
   0x4   :  { %14 = vsyncpa [#allocation4 + $0x1], 0 }
   0x5   :  { %15 = vsyncpa [#allocation6], 0  ;;  %s749_s20 = smov 0   ;;  %s751_s21 = smov 0  }
   0x6   :  { %s753_s22 = smov 0   ;;  %s755_s23 = smov 0  }
   0x7 LB: > { %s768_s4 = sadd.s32 4294967295, %s709_s23   ;;  %p41_p0 = scmp.ne.s32.totalorder %s701_s21, %s697_s20  ;;  %s709_s23 = sphi %s755_s23, %s897_s23   ;;  %s705_s22 = sphi %s753_s22, %s896_s22   ;;  %s701_s21 = sphi %s751_s21, %s895_s21   ;;  %s697_s20 = sphi %s749_s20, %s894_s20  }
   0x8   : > { %p883_p1 = scmp.eq.s32.totalorder %s768_s4, 0  ;;  %p512_p2 = scmp.ge.s32.totalorder %s709_s23, 1 }
   0x9   : > { %p162_p3 = scmp.lt.s32.totalorder %s709_s23, 3  ;;  %s711_s26 = smov [#allocation5]  }
   0xa   : > { %p776_p4 = por %p883_p1, %p41_p0  ;;  %s174_s27 = sshll.u32 %s711_s26, 4  ;;  %s175_s27 = int_to_ptr.vmem [resolvable:$true] %s174_s27 }
   0xb   : > { %p780_p5 = pnand %p512_p2, %p162_p3  ;;  %s793_s29 = sadd.s32 1, %s709_s23  }
   0xc   : > { %s886_s24 = scalar_select %p776_p4, 1, 0 }
   0xd   : > { %s887_s25 = scalar_select %p780_p5, 1, 0 }
   0xe   : > { %p546_p6 = pneg %p780_p5  ;;  %s28_s30 = sadd.s32 1, %s705_s22 }
   0xf   : > { %s25_s6 = ssub.s32 %s709_s23, %s793_s29  ;;  %s628_s7 = scalar_lea.vmem %s175_s27, 2048 }
  0x10   : > { %p788_p7 = pnand %p546_p6, %p883_p1  ;;  %p629_p9 = scmp.ne.s32.totalorder %s175_s27, %s628_s7 }
  0x11   : > { %p636_p12 = scmp.lt.s32.totalorder %s175_s27, %s175_s27  ;;  %p637_p13 = scmp.lt.s32.totalorder %s628_s7, %s628_s7 }
  0x12   : > { %p619_p8 = pneg %p788_p7 }
  0x13   : > { %p638_p0 = por %p637_p13, %p636_p12 }
  0x14   : > { %p631_p10 = pnand %p629_p9, %p619_p8 }
  0x16   : > { %p632_p11 = pneg %p631_p10 }
  0x18   : > { %p639_p2 = pnand %p638_p0, %p632_p11 }
  0x1a   : > { %642 = shalt.err (!%p639_p2)
}
  0x1b   : > { %s712_s8 = smov 128   ;;  %s713_s9 = smov 8  }
  0x1c   : > { %549 = dma.hbm_to_vmem [thread:$0]  (!%p788_p7), %s878_s1, 2048, %s175_s27, [#allocation6], %s712_s8, %s712_s8, %s713_s9  }
  0x1d   : > { %p26_p3 = scmp.eq.s32.totalorder %s25_s6, 0  ;;  %p35_p6 = scmp.ne.s32.totalorder %s705_s22, %s701_s21 }
  0x1e   : > { %p36_p8 = scmp.eq.s32.totalorder %s709_s23, 0  ;;  %p555_p9 = scmp.lt.s32.totalorder %s709_s23, 2 }
  0x1f   : > { %s810_s12 = scalar_select %p26_p3, %s705_s22, %s28_s30  }
  0x20   : > { %p37_p10 = por %p36_p8, %p35_p6  ;;  %s197_s13 = sand.u32 1, %s705_s22  }
  0x21   : > { %s515_s14 = sshll.u32 %s197_s13, 3  ;;  %s516_s15 = sshll.u32 %s709_s23, 7 }
  0x22   : > { %s817_s18 = scalar_lea.hbm %s877_s0, %s516_s15  ;;  %s201_s19 = scalar_lea.vmem [#allocation3], %s515_s14 }
  0x23   : > { %s208_s20 = sshll.u32 %s201_s19, 4  ;;  %p819_p7 = pnand %p555_p9, %p37_p10  ;;  %s209_s20 = int_to_ptr.vmem [resolvable:$true] %s208_s20 }
  0x24   : > { %s198_s27 = scalar_lea.sflag [#allocation4], %s197_s13  ;;  %s643_s28 = scalar_lea.hbm %s817_s18, 128 }
  0x25   : > { %p644_p11 = scmp.ne.s32.totalorder %s817_s18, %s643_s28  ;;  %p645_p12 = pneg %p819_p7 }
  0x26   : > { %s648_s6 = scalar_lea.hbm %s877_s0, 256  ;;  %p649_p2 = scmp.lt.s32.totalorder %s817_s18, %s877_s0 }
  0x27   : > { %p646_p13 = pnand %p645_p12, %p644_p11  ;;  %p650_p3 = scmp.lt.s32.totalorder %s648_s6, %s643_s28 }
  0x29   : > { %p647_p0 = pneg %p646_p13  ;;  %p651_p6 = por %p650_p3, %p649_p2 }
  0x2b   : > { %p652_p8 = pnand %p651_p6, %p647_p0 }
  0x2d   : > { %655 = shalt.err (!%p652_p8)
}
  0x2e   : > { %s656_s9 = scalar_lea.vmem %s209_s20, 128  ;;  %s714_s10 = smov [#allocation3]  }
  0x2f   : > { %p657_p9 = scmp.ne.s32.totalorder %s209_s20, %s656_s9  ;;  %s661_s11 = sshll.u32 %s714_s10, 4  ;;  %s662_s11 = int_to_ptr.vmem [resolvable:$false] %s661_s11 }
  0x30   : > { %s663_s13 = scalar_lea.vmem %s662_s11, 256  ;;  %p664_p11 = scmp.lt.s32.totalorder %s209_s20, %s662_s11 }
  0x31   : > { %p659_p10 = pnand %p657_p9, %p645_p12  ;;  %p665_p13 = scmp.lt.s32.totalorder %s663_s13, %s656_s9 }
  0x33   : > { %p660_p1 = pneg %p659_p10  ;;  %p666_p4 = por %p665_p13, %p664_p11 }
  0x35   : > { %p667_p5 = pnand %p666_p4, %p660_p1 }
  0x37   : > { %670 = shalt.err (!%p667_p5)
}
  0x38   : > { %553 = dma.hbm_to_vmem [thread:$0]  (!%p819_p7), %s817_s18, 128, %s209_s20, %s198_s27  }
  0x39   : > { %p890_p0 = scmp.ne.s32.totalorder %s887_s25, 0 }
  0x3a   : > { %s219_s14 = sand.u32 (!%p890_p0), 1, %s701_s21   ;;  %p891_p12 = scmp.ne.s32.totalorder (!%p890_p0), %s886_s24, 0 }
  0x3b   : > { %217 = sbr.rel (%p890_p0) target bundleno = 443 (0x1bb), region = 40  ;;  %s840_s15 = sshll.u32 (!%p890_p0), %s219_s14, 3 }
  0x3c   : > { %s220_s16 = scalar_lea.sflag (!%p890_p0), [#allocation4], %s219_s14  ;;  %s223_s17 = scalar_lea.vmem (!%p890_p0), [#allocation3], %s840_s15 }
  0x40   : > { %688 = dma.done.wait (%p891_p12), %s220_s16, 128  }
  0x41   : > { %690 = vsyncadd (%p891_p12), %s220_s16, 4294967168  ;;  %p892_p1 = scmp.eq.s32.totalorder %s768_s4, 0 }
  0x43   : > { %692 = dma.done.wait (%p892_p1), [#allocation6], 2048   ;;  %p893_p4 = pmov %p892_p1 }
  0x44   : > { %v715_v1 = vmov 0   ;;  %v593_v2 = vld [vmem:[#allocation5 + $0x74] ss:$8 sps:$4 sm:$0xff]   ;;  %v595_v3 = vld [vmem:[#allocation5 + $0x70] ss:$8 sps:$4 sm:$0xff]   ;;  %v278_v20 = vlaneseq  ;;  %p253_p5 = scmp.lt.s32.totalorder %s768_s4, 1 }
  0x45   : > { %694 = vsyncadd (%p893_p4), [#allocation6], 4294965248  ;;  %400 = vmatprep.mubr.bf16.mxu0 %v715_v1  ;;  %368 = vmatprep.subr.bf16.mxu0 %v593_v2  ;;  %v596_v4 = vld [vmem:[#allocation5 + $0x64] ss:$8 sps:$4 sm:$0xff]   ;;  %v598_v5 = vld [vmem:[#allocation5 + $0x60] ss:$8 sps:$4 sm:$0xff]  }
  0x46   : > { %369 = vmatpush1.bf16.msra.mxu0 %v595_v3  ;;  %v599_v6 = vld [vmem:[#allocation5 + $0x54] ss:$8 sps:$4 sm:$0xff]   ;;  %v601_v7 = vld [vmem:[#allocation5 + $0x50] ss:$8 sps:$4 sm:$0xff]   ;;  %v602_v8 = vld [vmem:[#allocation5 + $0x44] ss:$8 sps:$4 sm:$0xff]  }
  0x47   : > { %370 = vmatprep.subr.bf16.mxu0 %v596_v4  ;;  %v604_v9 = vld [vmem:[#allocation5 + $0x40] ss:$8 sps:$4 sm:$0xff]   ;;  %v605_v10 = vld [vmem:[#allocation5 + $0x34] ss:$8 sps:$4 sm:$0xff]   ;;  %v607_v11 = vld [vmem:[#allocation5 + $0x30] ss:$8 sps:$4 sm:$0xff]  }
  0x48   : > { %v608_v12 = vld [vmem:[#allocation5 + $0x24] ss:$8 sps:$4 sm:$0xff]   ;;  %v610_v13 = vld [vmem:[#allocation5 + $0x20] ss:$8 sps:$4 sm:$0xff]   ;;  %v611_v14 = vld [vmem:[#allocation5 + $0x14] ss:$8 sps:$4 sm:$0xff]  }
  0x49   : > { %v613_v15 = vld [vmem:[#allocation5 + $0x10] ss:$8 sps:$4 sm:$0xff]   ;;  %v614_v16 = vld [vmem:[#allocation5 + $0x4] ss:$8 sps:$4 sm:$0xff]   ;;  %v616_v17 = vld [vmem:[#allocation5] ss:$8 sps:$4 sm:$0xff]  }
  0x4a   : > { %371 = vmatpush1.bf16.msra.mxu0 %v598_v5  ;;  %v258_v18 = vld [vmem:[%s223_s17] sm:$0xff]  ;;  %v279_v21 = vshrl.u32 %v278_v20, 7  ;;  %s899_s4 = smov (!%p253_p5, %s768_s4), 1  ;;  %v537_v39 = vld [vmem:[#allocation2] ss:$0 sm:$0xff]  ;;  %vm434_vm0 = vcmask 7168  }
  0x4b   : > { %372 = vmatprep.subr.bf16.mxu0 %v599_v6  ;;  %v259_v19 = vpack.c.bf16 %v258_v18, %v258_v18  ;;  %v276_v23 = vld [vmem:[%s879_s2] sm:$0x3]  ;;  %s520_s20 = sshll.u32 %s899_s4, 3 }
  0x4c   : > { %v280_v22 = vsub.s32 0, %v279_v21  ;;  %v284_v24 = vsub.s32 1, %v279_v21  ;;  %v409_v26 = vld [vmem:[%s880_s3] sm:$0x3]  ;;  %s256_s28 = scalar_lea.vmem %s882_s5, %s520_s20 }
  0x4e   : > { %373 = vmatpush1.bf16.msra.mxu0 %v601_v7  ;;  %v281_v25 = vrot.slane %v276_v23, %v280_v22  ;;  %v285_v27 = vrot.slane %v276_v23, %v284_v24  ;;  %v414_v30 = vrot.slane %v409_v26, %v280_v22  ;;  %v418_v31 = vrot.slane %v409_v26, %v284_v24 }
  0x4f   : > { %374 = vmatprep.subr.bf16.mxu0 %v602_v8 }
  0x52   : > { %375 = vmatpush1.bf16.msra.mxu0 %v604_v9 }
  0x53   : > { %376 = vmatprep.subr.bf16.mxu0 %v605_v10 }
  0x56   : > { %377 = vmatpush1.bf16.msra.mxu0 %v607_v11 }
  0x57   : > { %378 = vmatprep.subr.bf16.mxu0 %v608_v12 }
  0x5a   : > { %379 = vmatpush1.bf16.msra.mxu0 %v610_v13 }
  0x5b   : > { %380 = vmatprep.subr.bf16.mxu0 %v611_v14 }
  0x5e   : > { %381 = vmatpush1.bf16.msra.mxu0 %v613_v15 }
  0x5f   : > { %382 = vmatprep.subr.bf16.mxu0 %v614_v16 }
  0x62   : > { %383 = vmatpush1.bf16.msra.mxu0 %v616_v17 }
  0x65   : > { %401 = vmatmul.mubr.bf16.vlgmr.msra.gmra.mxu0 %v259_v19 }
 0x125   : > { %v402_v28 = vpop.f32.mrf.mxu0 }
 0x126   : > { %v403_v29 = vadd.f32 %v402_v28, %v281_v25 }
 0x127   : > { %v404_v32 = vpop.f32.mrf.mxu0 }
 0x128   : > { %v405_v33 = vadd.f32 %v404_v32, %v285_v27  ;;  %v421_v35 = vmul.f32 %v414_v30, %v403_v29 }
 0x129   : > { %v406_v34 = vpop.f32.mrf.mxu0 }
 0x12a   : > { %v422_v36 = vmul.f32 %v418_v31, %v405_v33 }
 0x12b   : > { %v407_v37 = vpop.f32.mrf.mxu0 }
 0x12c   : > { %v423_v38 = vadd.f32 %v422_v36, %v421_v35 }
 0x12e   : > { %424 = vadd.xlane.f32.xlu0 %v423_v38 }
 0x1b7   : > { %v425_v40 = vpop.xlane.xlu0 %424 }
 0x1b8   : > { %v433_v41 = vadd.f32 %v537_v39, %v425_v40 }
 0x1ba   : > { %435 = vst.msk [vmem:[%s256_s28] sm:$0xff] %vm434_vm0, %v433_v41 }
 0x1bb PF: > { %p18_p7 = scmp.ge.s32.totalorder %s793_s29, 4   ;;  %s894_s20 = smov %s701_s21 }
 0x1bc   : > { %s895_s21 = smov %s705_s22  ;;  %s896_s22 = smov %s810_s12 }
 0x1bd   : > { %s897_s23 = smov %s793_s29  ;;  %20 = sbr.rel (!%p18_p7) target bundleno = 7 (0x7), region = 84 }
 0x1c2   :  { %455 = vsyncpa [#allocation4], 1 }
 0x1c3   :  { %457 = vsyncpa [#allocation4 + $0x1], 1 }
 0x1c4   :  { %458 = vsyncpa [#allocation6], 1 }

</bundles_post_ra>
